<compile_context>
chip_gen: v5e
topology: v5e:2x2
jax: 0.10.0
libtpu: 0.0.40
codegen_flags: <defaults>
</compile_context>

<pallas_src>
import jax
import jax.numpy as jnp
from jax import lax
from jax.experimental import pallas as pl
from jax.experimental.pallas import tpu as pltpu


def mlp_kernel(x_ref, w0_ref, b0_ref, w1_ref, b1_ref, o_ref):
    # net0: h^T = relu(W0 @ x^T + b0), lane-dense (10, bm).
    # Contracting x's feature dim (size 20, the lane dim of the (bm, 20)
    # block) against W0's dim 1 puts the batch on the lanes; the implied
    # transpose runs on the MXU/XLU, which have plenty of slack here.
    h = lax.dot_general(
        w0_ref[...], x_ref[...],
        dimension_numbers=(((1,), (1,)), ((), ())),
        preferred_element_type=jnp.float32)              # (10, bm) f32
    h = jnp.maximum(h + b0_ref[...], 0.0)                # + (10, 1) bias, ReLU
    # net1: y^T = W1 @ h^T + b1
    y = jnp.dot(w1_ref[...], h,
                preferred_element_type=jnp.float32)      # (10, bm) f32
    y = y + b1_ref[...]
    # Batch-major store straight into the (B, 10) output block (masked vst,
    # still far cheaper than a separate wrapper-side transpose HBM pass).
    o_ref[...] = y.T.astype(o_ref.dtype)                 # (bm, 10)


def _round_up(a, m):
    return (a + m - 1) // m * m


def _f32(a):
    return a if a.dtype == jnp.float32 else a.astype(jnp.float32)


def dummy_model_forward(x, w0, b0, w1, b1, *, block_b=16384):
    """Fused Linear(20,10) -> ReLU -> Linear(10,10).

    x:  (B, 20) float32 (native batch-major layout, streamed as-is)
    w0: (10, 20)  (PyTorch nn.Linear layout: (out_features, in_features))
    b0: (10,)
    w1: (10, 10)
    b1: (10,)
    returns (B, 10) float32
    """
    B, K = x.shape
    N0 = w0.shape[0]
    N1 = w1.shape[0]

    # Batch tile: big enough to amortize the ~0.35 us/step grid overhead,
    # small enough that double-buffered in+out blocks fit VMEM on v7x.
    bm = min(_round_up(block_b, 128), _round_up(B, 128))
    if bm >= B:
        if B >= 256:
            # >= 2 grid steps so dimension_semantics=("parallel",) can shard
            # across v7x's two TensorCores; tiles stay large so the extra
            # step overhead is noise on v5e/v6e.
            bm = _round_up(pl.cdiv(B, 2), 8)
        else:
            bm = B  # full-extent block, single step
    steps = pl.cdiv(B, bm)  # ragged tail (if any) handled by Pallas, no padding

    b0c = _f32(b0).reshape(N0, 1)
    b1c = _f32(b1).reshape(N1, 1)

    cost = pl.CostEstimate(
        flops=2 * B * (K * N0 + N0 * N1),
        transcendentals=0,
        bytes_accessed=B * (K + N1) * 4
        + (w0.size + w1.size + b0.size + b1.size) * 4,
    )

    return pl.pallas_call(
        mlp_kernel,
        out_shape=jax.ShapeDtypeStruct((B, N1), jnp.float32),
        grid=(steps,),
        in_specs=[
            pl.BlockSpec((bm, K), lambda i: (i, 0)),     # x tile (streamed, native layout)
            pl.BlockSpec((N0, K), lambda i: (0, 0)),     # W0 (VMEM-resident)
            pl.BlockSpec((N0, 1), lambda i: (0, 0)),     # b0 (resident)
            pl.BlockSpec((N1, N0), lambda i: (0, 0)),    # W1 (resident)
            pl.BlockSpec((N1, 1), lambda i: (0, 0)),     # b1 (resident)
        ],
        out_specs=pl.BlockSpec((bm, N1), lambda i: (i, 0)),  # y tile (streamed)
        compiler_params=pltpu.CompilerParams(
            dimension_semantics=("parallel",),
            vmem_limit_bytes=48 * 1024 * 1024,
        ),
        cost_estimate=cost,
    )(_f32(x), _f32(w0), b0c, _f32(w1), b1c)


def init_params(key):
    """Deterministic init matching nn.Linear's U(-1/sqrt(fan_in), 1/sqrt(fan_in)),
    stored in PyTorch (out_features, in_features) layout."""
    k0, k1, k2, k3 = jax.random.split(key, 4)
    lim0 = 1.0 / jnp.sqrt(20.0)
    lim1 = 1.0 / jnp.sqrt(10.0)
    w0 = jax.random.uniform(k0, (10, 20), jnp.float32, -lim0, lim0)
    b0 = jax.random.uniform(k1, (10,), jnp.float32, -lim0, lim0)
    w1 = jax.random.uniform(k2, (10, 10), jnp.float32, -lim1, lim1)
    b1 = jax.random.uniform(k3, (10,), jnp.float32, -lim1, lim1)
    return w0, b0, w1, b1


if __name__ == "__main__":
    key = jax.random.PRNGKey(0)
    kx, kp = jax.random.split(key)
    w0, b0, w1, b1 = init_params(kp)

    # Two small-but-representative cases (block_b=256 keeps the grid multi-step):
    #   512 -> even 2-step grid (streamed x tiles, resident weights)
    #   300 -> ragged last tile (B not a multiple of 128; no padding pass)
    for batch in (512, 300):
        x = jax.random.normal(jax.random.fold_in(kx, batch),
                              (batch, 20), jnp.float32)
        y = jax.block_until_ready(
            dummy_model_forward(x, w0, b0, w1, b1, block_b=256))

        # Pure-JAX f32 reference (PyTorch semantics: x @ W.T + b).
        ref = jnp.maximum(x @ w0.T + b0, 0.0) @ w1.T + b1
        assert y.shape == (batch, 10)
        # Everything is f32 end-to-end; the tolerance only covers the TPU
        # MXU's default-precision f32 matmul path (no bf16 storage anywhere).
        assert jnp.allclose(y, ref, atol=2e-2, rtol=2e-2), (
            float(jnp.max(jnp.abs(y - ref))))

    print("KERNEL_OK")
</pallas_src>

<mosaic_0001>
module attributes {stable_mosaic.version = 11 : i64} {
  func.func @mlp_kernel(%arg0: i32, %arg1: memref<256x20xf32, #tpu.memory_space<vmem>>, %arg2: memref<10x20xf32, #tpu.memory_space<vmem>>, %arg3: memref<10x1xf32, #tpu.memory_space<vmem>>, %arg4: memref<10x10xf32, #tpu.memory_space<vmem>>, %arg5: memref<10x1xf32, #tpu.memory_space<vmem>>, %arg6: memref<256x10xf32, #tpu.memory_space<vmem>>) attributes {dimension_semantics = [#tpu.dimension_semantics<parallel>], iteration_bounds = array<i64: 2>, scalar_prefetch = 0 : i64, scratch_operands = 0 : i64, tpu.core_type = #tpu.core_type<tc>, window_params = [{transform_indices = @transform_0, window_bounds = array<i64: 256, 20>}, {pipeline_mode = #tpu.pipeline_mode<synchronous>, transform_indices = @transform_1, window_bounds = array<i64: 10, 20>}, {pipeline_mode = #tpu.pipeline_mode<synchronous>, transform_indices = @transform_2, window_bounds = array<i64: 10, 1>}, {pipeline_mode = #tpu.pipeline_mode<synchronous>, transform_indices = @transform_3, window_bounds = array<i64: 10, 10>}, {pipeline_mode = #tpu.pipeline_mode<synchronous>, transform_indices = @transform_4, window_bounds = array<i64: 10, 1>}, {transform_indices = @transform_5, window_bounds = array<i64: 256, 10>}]} {
    %c0 = arith.constant 0 : index
    %c0_0 = arith.constant 0 : index
    %0 = vector.load %arg2[%c0, %c0_0] : memref<10x20xf32, #tpu.memory_space<vmem>>, vector<10x20xf32>
    %c0_1 = arith.constant 0 : index
    %c0_2 = arith.constant 0 : index
    %1 = vector.load %arg1[%c0_1, %c0_2] : memref<256x20xf32, #tpu.memory_space<vmem>>, vector<256x20xf32>
    %cst = arith.constant dense<0.000000e+00> : vector<10x256xf32>
    %2 = tpu.matmul %0, %1, %cst {dimension_numbers = #tpu.dot_dimension_numbers<[1], [1], [0], [0], [0, 0, 1, 0], [], []>} : vector<10x20xf32>, vector<256x20xf32>, vector<10x256xf32> -> vector<10x256xf32>
    %c0_3 = arith.constant 0 : index
    %c0_4 = arith.constant 0 : index
    %3 = vector.load %arg3[%c0_3, %c0_4] : memref<10x1xf32, #tpu.memory_space<vmem>>, vector<10x1xf32>
    %4 = vector.broadcast %3 : vector<10x1xf32> to vector<10x256xf32>
    %5 = arith.addf %2, %4 : vector<10x256xf32>
    %cst_5 = arith.constant 0.000000e+00 : f32
    %6 = vector.broadcast %cst_5 : f32 to vector<10x256xf32>
    %7 = arith.maximumf %5, %6 : vector<10x256xf32>
    %c0_6 = arith.constant 0 : index
    %c0_7 = arith.constant 0 : index
    %8 = vector.load %arg4[%c0_6, %c0_7] : memref<10x10xf32, #tpu.memory_space<vmem>>, vector<10x10xf32>
    %cst_8 = arith.constant dense<0.000000e+00> : vector<10x256xf32>
    %9 = tpu.matmul %8, %7, %cst_8 {dimension_numbers = #tpu.dot_dimension_numbers<[1], [0], [0], [1], [0, 0, 1, 1], [], []>} : vector<10x10xf32>, vector<10x256xf32>, vector<10x256xf32> -> vector<10x256xf32>
    %c0_9 = arith.constant 0 : index
    %c0_10 = arith.constant 0 : index
    %10 = vector.load %arg5[%c0_9, %c0_10] : memref<10x1xf32, #tpu.memory_space<vmem>>, vector<10x1xf32>
    %11 = vector.broadcast %10 : vector<10x1xf32> to vector<10x256xf32>
    %12 = arith.addf %9, %11 : vector<10x256xf32>
    %13 = tpu.transpose %12, [1, 0] : vector<10x256xf32> -> vector<256x10xf32>
    %c0_11 = arith.constant 0 : index
    %c0_12 = arith.constant 0 : index
    %14 = vector.load %arg6[%c0_11, %c0_12] : memref<256x10xf32, #tpu.memory_space<vmem>>, vector<256x10xf32>
    tpu.vector_store %arg6[%c0_11, %c0_12], %13 {strides = array<i32>} : memref<256x10xf32, #tpu.memory_space<vmem>>, vector<256x10xf32>,
    return
  }
  func.func @transform_0(%arg0: i32) -> (i32, i32) {
    %c0_i32 = arith.constant 0 : i32
    %c0_i32_0 = arith.constant 0 : i32
    return %arg0, %c0_i32 : i32, i32
  }
  func.func @transform_1(%arg0: i32) -> (i32, i32) {
    %c0_i32 = arith.constant 0 : i32
    %c0_i32_0 = arith.constant 0 : i32
    %c0_i32_1 = arith.constant 0 : i32
    return %c0_i32, %c0_i32_0 : i32, i32
  }
  func.func @transform_2(%arg0: i32) -> (i32, i32) {
    %c0_i32 = arith.constant 0 : i32
    %c0_i32_0 = arith.constant 0 : i32
    %c0_i32_1 = arith.constant 0 : i32
    return %c0_i32, %c0_i32_0 : i32, i32
  }
  func.func @transform_3(%arg0: i32) -> (i32, i32) {
    %c0_i32 = arith.constant 0 : i32
    %c0_i32_0 = arith.constant 0 : i32
    %c0_i32_1 = arith.constant 0 : i32
    return %c0_i32, %c0_i32_0 : i32, i32
  }
  func.func @transform_4(%arg0: i32) -> (i32, i32) {
    %c0_i32 = arith.constant 0 : i32
    %c0_i32_0 = arith.constant 0 : i32
    %c0_i32_1 = arith.constant 0 : i32
    return %c0_i32, %c0_i32_0 : i32, i32
  }
  func.func @transform_5(%arg0: i32) -> (i32, i32) {
    %c0_i32 = arith.constant 0 : i32
    %c0_i32_0 = arith.constant 0 : i32
    return %arg0, %c0_i32 : i32, i32
  }
}

</mosaic_0001>

<bundles_post_ra>
// kernel: tpu_custom_call.1
= control target key start
LH: loop header
LB: loop body
LE: loop exit
PB: predicated region body
PF: predicated region fallthrough
CT: control target
= control target key end

     0   :  { %s757_s18 = smov 0   ;;  %s945_s0 = inlined_call_operand.vmem [shape: f32[512,20], index: 0, kind: input, shape index: {}]   ;;  %s946_s1 = inlined_call_operand.vmem [shape: f32[10,20], index: 1, kind: input, shape index: {}]   ;;  %s947_s2 = inlined_call_operand.vmem [shape: f32[10,1], index: 2, kind: input, shape index: {}]   ;;  %s948_s3 = inlined_call_operand.vmem [shape: f32[10,10], index: 3, kind: input, shape index: {}]   ;;  %s949_s4 = inlined_call_operand.vmem [shape: f32[10,1], index: 4, kind: input, shape index: {}]   ;;  %s950_s5 = inlined_call_operand.vmem [shape: f32[512,10], index: 5, kind: output, shape index: {}]  }
   0x1 LB: > { %s653_s19 = sadd.s32 4294967295, %s724_s18   ;;  %p657_p0 = scmp.ge.s32.totalorder %s724_s18, 1  ;;  %s724_s18 = sphi %s757_s18, %s15_s18  }
   0x2   : > { %p188_p1 = scmp.lt.s32.totalorder %s724_s18, 3 }
   0x4   : > { %p189_p2 = pnand %p657_p0, %p188_p1 }
   0x5   : > { %s658_s20 = sshll.u32 (!%p189_p2), %s653_s19, 5 }
   0x6   : > { %192 = sbr.rel (%p189_p2) target bundleno = 640 (0x280), region = 40  ;;  %p217_p3 = scmp.lt.s32.totalorder (!%p189_p2), %s658_s20, 63 }
   0xb   : > { %s952_s20 = smov (!%p217_p3, %s658_s20), 63  ;;  %vm274_vm0 = vcmask 162816   ;;  %v263_v18 = vld [vmem:[%s947_s2 + $0x8] sm:$0x3]  ;;  %v726_v21 = vmov 0   ;;  %v262_v24 = vld [vmem:[%s947_s2] sm:$0xff] }
   0xc   : > { %s659_s21 = sshll.u32 %s952_s20, 3  ;;  %716 = vset.pattern.permute.xlu0 %v726_v21  ;;  %717 = vset.pattern.permute.xlu1 %v726_v21  ;;  %v228_v35 = vld [vmem:[%s946_s1] sm:$0xff]  ;;  %v229_v36 = vld [vmem:[%s946_s1 + $0x8] sm:$0x3]  ;;  %vm448_vm1 = vcmask 1041408   ;;  %vm441_vm2 = vcmask 80896  }
   0xd   : > { %s773_s24 = scalar_lea.vmem %s945_s0, %s659_s21  ;;  %271 = vperm.xlu0 %716, %v263_v18   ;;  %v429_v37 = vld [vmem:[%s949_s4] sm:$0xff]  ;;  %v430_v39 = vld [vmem:[%s949_s4 + $0x8] sm:$0x3]  ;;  %s876_s19 = scalar_lea.vmem %s950_s5, %s659_s21 }
   0xe   : > { %v245_v0 = vld [vmem:[%s773_s24 + $0x78] sm:$0xff]  ;;  %v244_v2 = vld [vmem:[%s773_s24 + $0x70] sm:$0xff]  ;;  %v243_v4 = vld [vmem:[%s773_s24 + $0x68] sm:$0xff]  ;;  %433 = vperm.xlu1 %717, %v429_v37  }
   0xf   : > { %v261_v1 = vld [vmem:[%s773_s24 + $0xf8] sm:$0xff]  ;;  %662 = vmatpush.xpose.msk.msra.mxu0 %vm274_vm0, %v245_v0  ;;  %v260_v3 = vld [vmem:[%s773_s24 + $0xf0] sm:$0xff]  ;;  %v259_v5 = vld [vmem:[%s773_s24 + $0xe8] sm:$0xff] }
  0x10   : > { %680 = vmatpush.xpose.msk.msra.mxu1 %vm274_vm0, %v261_v1  ;;  %v242_v6 = vld [vmem:[%s773_s24 + $0x60] sm:$0xff]  ;;  %v241_v8 = vld [vmem:[%s773_s24 + $0x58] sm:$0xff]  ;;  %v240_v10 = vld [vmem:[%s773_s24 + $0x50] sm:$0xff] }
  0x11   : > { %v258_v7 = vld [vmem:[%s773_s24 + $0xe0] sm:$0xff]  ;;  %v257_v9 = vld [vmem:[%s773_s24 + $0xd8] sm:$0xff]  ;;  %v256_v11 = vld [vmem:[%s773_s24 + $0xd0] sm:$0xff] }
  0x12   : > { %v239_v12 = vld [vmem:[%s773_s24 + $0x48] sm:$0xff]  ;;  %v238_v14 = vld [vmem:[%s773_s24 + $0x40] sm:$0xff]  ;;  %v237_v16 = vld [vmem:[%s773_s24 + $0x38] sm:$0xff] }
  0x13   : > { %663 = vmatpush.xpose.msk.msra.mxu0 %vm274_vm0, %v244_v2  ;;  %v255_v13 = vld [vmem:[%s773_s24 + $0xc8] sm:$0xff]  ;;  %v254_v15 = vld [vmem:[%s773_s24 + $0xc0] sm:$0xff]  ;;  %v253_v17 = vld [vmem:[%s773_s24 + $0xb8] sm:$0xff] }
  0x14   : > { %681 = vmatpush.xpose.msk.msra.mxu1 %vm274_vm0, %v260_v3  ;;  %v236_v19 = vld [vmem:[%s773_s24 + $0x30] sm:$0xff]  ;;  %v235_v22 = vld [vmem:[%s773_s24 + $0x28] sm:$0xff]  ;;  %v234_v25 = vld [vmem:[%s773_s24 + $0x20] sm:$0xff] }
  0x15   : > { %v252_v20 = vld [vmem:[%s773_s24 + $0xb0] sm:$0xff]  ;;  %v251_v23 = vld [vmem:[%s773_s24 + $0xa8] sm:$0xff]  ;;  %v250_v26 = vld [vmem:[%s773_s24 + $0xa0] sm:$0xff]  ;;  %266 = vperm.xlu0 %716, %v262_v24  }
  0x16   : > { %v233_v27 = vld [vmem:[%s773_s24 + $0x18] sm:$0xff]  ;;  %v232_v29 = vld [vmem:[%s773_s24 + $0x10] sm:$0xff]  ;;  %v231_v31 = vld [vmem:[%s773_s24 + $0x8] sm:$0xff]  ;;  %438 = vperm.xlu1 %717, %v430_v39  }
  0x17   : > { %664 = vmatpush.xpose.msk.msra.mxu0 %vm274_vm0, %v243_v4  ;;  %v249_v28 = vld [vmem:[%s773_s24 + $0x98] sm:$0xff]  ;;  %v248_v30 = vld [vmem:[%s773_s24 + $0x90] sm:$0xff]  ;;  %v247_v32 = vld [vmem:[%s773_s24 + $0x88] sm:$0xff] }
  0x18   : > { %682 = vmatpush.xpose.msk.msra.mxu1 %vm274_vm0, %v259_v5  ;;  %v230_v33 = vld [vmem:[%s773_s24] sm:$0xff]  ;;  %v428_v54 = vld [vmem:[%s948_s3 + $0x8] sm:$0x3] }
  0x19   : > { %v246_v34 = vld [vmem:[%s773_s24 + $0x80] sm:$0xff] }
  0x1a   : > { %v427_v53 = vld [vmem:[%s948_s3] sm:$0xff] }
  0x1b   : > { %665 = vmatpush.xpose.msk.msra.mxu0 %vm274_vm0, %v242_v6 }
  0x1c   : > { %683 = vmatpush.xpose.msk.msra.mxu1 %vm274_vm0, %v258_v7 }
  0x1f   : > { %666 = vmatpush.xpose.msk.msra.mxu0 %vm274_vm0, %v241_v8 }
  0x20   : > { %684 = vmatpush.xpose.msk.msra.mxu1 %vm274_vm0, %v257_v9 }
  0x23   : > { %667 = vmatpush.xpose.msk.msra.mxu0 %vm274_vm0, %v240_v10 }
  0x24   : > { %685 = vmatpush.xpose.msk.msra.mxu1 %vm274_vm0, %v256_v11 }
  0x27   : > { %668 = vmatpush.xpose.msk.msra.mxu0 %vm274_vm0, %v239_v12 }
  0x28   : > { %686 = vmatpush.xpose.msk.msra.mxu1 %vm274_vm0, %v255_v13 }
  0x2b   : > { %669 = vmatpush.xpose.msk.msra.mxu0 %vm274_vm0, %v238_v14 }
  0x2c   : > { %687 = vmatpush.xpose.msk.msra.mxu1 %vm274_vm0, %v254_v15 }
  0x2f   : > { %670 = vmatpush.xpose.msk.msra.mxu0 %vm274_vm0, %v237_v16 }
  0x30   : > { %688 = vmatpush.xpose.msk.msra.mxu1 %vm274_vm0, %v253_v17 }
  0x33   : > { %671 = vmatpush.xpose.msk.msra.mxu0 %vm274_vm0, %v236_v19 }
  0x34   : > { %689 = vmatpush.xpose.msk.msra.mxu1 %vm274_vm0, %v252_v20 }
  0x37   : > { %672 = vmatpush.xpose.msk.msra.mxu0 %vm274_vm0, %v235_v22 }
  0x38   : > { %690 = vmatpush.xpose.msk.msra.mxu1 %vm274_vm0, %v251_v23 }
  0x3b   : > { %673 = vmatpush.xpose.msk.msra.mxu0 %vm274_vm0, %v234_v25 }
  0x3c   : > { %691 = vmatpush.xpose.msk.msra.mxu1 %vm274_vm0, %v250_v26 }
  0x3f   : > { %674 = vmatpush.xpose.msk.msra.mxu0 %vm274_vm0, %v233_v27 }
  0x40   : > { %692 = vmatpush.xpose.msk.msra.mxu1 %vm274_vm0, %v249_v28 }
  0x43   : > { %675 = vmatpush.xpose.msk.msra.mxu0 %vm274_vm0, %v232_v29 }
  0x44   : > { %693 = vmatpush.xpose.msk.msra.mxu1 %vm274_vm0, %v248_v30 }
  0x47   : > { %676 = vmatpush.xpose.msk.msra.mxu0 %vm274_vm0, %v231_v31 }
  0x48   : > { %694 = vmatpush.xpose.msk.msra.mxu1 %vm274_vm0, %v247_v32 }
  0x4b   : > { %677 = vmatpush.xpose.msk.msra.mxu0 %vm274_vm0, %v230_v33 }
  0x4c   : > { %695 = vmatpush.xpose.msk.msra.mxu1 %vm274_vm0, %v246_v34 }
  0x4e   : > { %678 = vmatmul.msk.f32.vlgmr.msra.gmra.mxu0 %vm274_vm0, %v228_v35 }
  0x4f   : > { %696 = vmatmul.msk.f32.vlgmr.msra.gmra.mxu1 %vm274_vm0, %v228_v35 }
  0x56   : > { %679 = vmatmul.msk.f32.gmra.mxu0 %vm274_vm0, %v229_v36 }
  0x57   : > { %697 = vmatmul.msk.f32.gmra.mxu1 %vm274_vm0, %v229_v36 }
  0x7f   : > { %v272_v38 = vpop.permute.xlu0 %271 }
  0x80   : > { %v434_v55 = vpop.permute.xlu1 %433 }
  0x87   : > { %v267_v42 = vpop.permute.xlu0 %266 }
  0x88   : > { %v439_v60 = vpop.permute.xlu1 %438 }
  0xcb   : > { %v394_v40 = vpop.f32.mrf.mxu0 }
  0xcc   : > { %v417_v41 = vpop.f32.mrf.mxu1  ;;  %v395_v45 = vadd.f32 %v394_v40, %v267_v42 }
  0xcd   : > { %v418_v46 = vadd.f32 %v417_v41, %v267_v42 }
  0xce   : > { %v423_v51 = vmax.f32 %v395_v45, 0.0 }
  0xcf   : > { %v424_v52 = vmax.f32 %v418_v46, 0.0 }
  0xd3   : > { %v397_v43 = vpop.f32.mrf.mxu0 }
  0xd4   : > { %v420_v44 = vpop.f32.mrf.mxu1  ;;  %v398_v47 = vadd.f32 %v397_v43, %v272_v38 }
  0xd5   : > { %v421_v48 = vadd.f32 %v420_v44, %v272_v38 }
  0xd6   : > { %v425_v49 = vmax.f32 %v398_v47, 0.0 }
  0xd7   : > { %v426_v50 = vmax.f32 %v421_v48, 0.0 }
  0xd8   : > { %698 = vmatpush.msk.msra.mxu2 %vm448_vm1, %v425_v49 }
  0xd9   : > { %701 = vmatpush.msk.msra.mxu3 %vm448_vm1, %v426_v50 }
  0xda   : > { %470 = vmatpush.msra.mxu2 %v423_v51 }
  0xdb   : > { %493 = vmatpush.msra.mxu3 %v424_v52  ;;  %699 = vmatmul.msk.f32.vlgmr.msra.gmra.mxu2 %vm441_vm2, %v427_v53 }
  0xdc   : > { %702 = vmatmul.msk.f32.vlgmr.msra.gmra.mxu3 %vm441_vm2, %v427_v53 }
  0xe3   : > { %700 = vmatmul.msk.f32.gmra.mxu2 %vm441_vm2, %v428_v54 }
  0xe4   : > { %703 = vmatmul.msk.f32.gmra.mxu3 %vm441_vm2, %v428_v54 }
 0x15e   : > { %v472_v56 = vpop.f32.mrf.mxu2 }
 0x15f   : > { %v495_v57 = vpop.f32.mrf.mxu3  ;;  %v473_v59 = vadd.f32 %v472_v56, %v434_v55 }
 0x160   : > { %v496_v58 = vadd.f32 %v495_v57, %v434_v55 }
 0x161   : > { %501 = vxpose.xlu2.b32.start [1/2] (short) %v473_v59, 128 }
 0x162   : > { %533 = vxpose.xlu0.b32.start [1/2] (short) %v496_v58, 128 }
 0x166   : > { %v475_v61 = vpop.f32.mrf.mxu2 }
 0x167   : > { %v498_v62 = vpop.f32.mrf.mxu3  ;;  %v476_v63 = vadd.f32 %v475_v61, %v439_v60 }
 0x168   : > { %v499_v0 = vadd.f32 %v498_v62, %v439_v60 }
 0x169   : > { %502 = vxpose.xlu2.b32.end [2/2] (short) %v476_v63, 128 }
 0x16a   : > { %534 = vxpose.xlu0.b32.end [2/2] (short) %v499_v0, 128 }
 0x1fa   : > { %v517_v1 = vpop.trf.xlu2 }
 0x1fb   : > { %565 = vst.msk [vmem:[%s876_s19] sm:$0xff] %vm441_vm2, %v517_v1 }
 0x202   : > { %v518_v2 = vpop.trf.xlu2 }
 0x203   : > { %566 = vst.msk [vmem:[%s876_s19 + $0x8] sm:$0xff] %vm441_vm2, %v518_v2 }
 0x206   : > { %v549_v3 = vpop.trf.xlu0 }
 0x207   : > { %581 = vst.msk [vmem:[%s876_s19 + $0x80] sm:$0xff] %vm441_vm2, %v549_v3 }
 0x20a   : > { %v519_v4 = vpop.trf.xlu2 }
 0x20b   : > { %567 = vst.msk [vmem:[%s876_s19 + $0x10] sm:$0xff] %vm441_vm2, %v519_v4 }
 0x20e   : > { %v550_v5 = vpop.trf.xlu0 }
 0x20f   : > { %582 = vst.msk [vmem:[%s876_s19 + $0x88] sm:$0xff] %vm441_vm2, %v550_v5 }
 0x212   : > { %v520_v6 = vpop.trf.xlu2 }
 0x213   : > { %568 = vst.msk [vmem:[%s876_s19 + $0x18] sm:$0xff] %vm441_vm2, %v520_v6 }
 0x216   : > { %v551_v7 = vpop.trf.xlu0 }
 0x217   : > { %583 = vst.msk [vmem:[%s876_s19 + $0x90] sm:$0xff] %vm441_vm2, %v551_v7 }
 0x21a   : > { %v521_v8 = vpop.trf.xlu2 }
 0x21b   : > { %569 = vst.msk [vmem:[%s876_s19 + $0x20] sm:$0xff] %vm441_vm2, %v521_v8 }
 0x21e   : > { %v552_v9 = vpop.trf.xlu0 }
 0x21f   : > { %584 = vst.msk [vmem:[%s876_s19 + $0x98] sm:$0xff] %vm441_vm2, %v552_v9 }
 0x222   : > { %v522_v10 = vpop.trf.xlu2 }
 0x223   : > { %570 = vst.msk [vmem:[%s876_s19 + $0x28] sm:$0xff] %vm441_vm2, %v522_v10 }
 0x226   : > { %v553_v11 = vpop.trf.xlu0 }
 0x227   : > { %585 = vst.msk [vmem:[%s876_s19 + $0xa0] sm:$0xff] %vm441_vm2, %v553_v11 }
 0x22a   : > { %v523_v12 = vpop.trf.xlu2 }
 0x22b   : > { %571 = vst.msk [vmem:[%s876_s19 + $0x30] sm:$0xff] %vm441_vm2, %v523_v12 }
 0x22e   : > { %v554_v13 = vpop.trf.xlu0 }
 0x22f   : > { %586 = vst.msk [vmem:[%s876_s19 + $0xa8] sm:$0xff] %vm441_vm2, %v554_v13 }
 0x232   : > { %v524_v14 = vpop.trf.xlu2 }
 0x233   : > { %572 = vst.msk [vmem:[%s876_s19 + $0x38] sm:$0xff] %vm441_vm2, %v524_v14 }
 0x236   : > { %v555_v15 = vpop.trf.xlu0 }
 0x237   : > { %587 = vst.msk [vmem:[%s876_s19 + $0xb0] sm:$0xff] %vm441_vm2, %v555_v15 }
 0x23a   : > { %v525_v16 = vpop.trf.xlu2 }
 0x23b   : > { %573 = vst.msk [vmem:[%s876_s19 + $0x40] sm:$0xff] %vm441_vm2, %v525_v16 }
 0x23e   : > { %v556_v17 = vpop.trf.xlu0 }
 0x23f   : > { %588 = vst.msk [vmem:[%s876_s19 + $0xb8] sm:$0xff] %vm441_vm2, %v556_v17 }
 0x242   : > { %v526_v18 = vpop.trf.xlu2 }
 0x243   : > { %574 = vst.msk [vmem:[%s876_s19 + $0x48] sm:$0xff] %vm441_vm2, %v526_v18 }
 0x246   : > { %v557_v19 = vpop.trf.xlu0 }
 0x247   : > { %589 = vst.msk [vmem:[%s876_s19 + $0xc0] sm:$0xff] %vm441_vm2, %v557_v19 }
 0x24a   : > { %v527_v20 = vpop.trf.xlu2 }
 0x24b   : > { %575 = vst.msk [vmem:[%s876_s19 + $0x50] sm:$0xff] %vm441_vm2, %v527_v20 }
 0x24e   : > { %v558_v21 = vpop.trf.xlu0 }
 0x24f   : > { %590 = vst.msk [vmem:[%s876_s19 + $0xc8] sm:$0xff] %vm441_vm2, %v558_v21 }
 0x252   : > { %v528_v22 = vpop.trf.xlu2 }
 0x253   : > { %576 = vst.msk [vmem:[%s876_s19 + $0x58] sm:$0xff] %vm441_vm2, %v528_v22 }
 0x256   : > { %v559_v23 = vpop.trf.xlu0 }
 0x257   : > { %591 = vst.msk [vmem:[%s876_s19 + $0xd0] sm:$0xff] %vm441_vm2, %v559_v23 }
 0x25a   : > { %v529_v24 = vpop.trf.xlu2 }
 0x25b   : > { %577 = vst.msk [vmem:[%s876_s19 + $0x60] sm:$0xff] %vm441_vm2, %v529_v24 }
 0x25e   : > { %v560_v25 = vpop.trf.xlu0 }
 0x25f   : > { %592 = vst.msk [vmem:[%s876_s19 + $0xd8] sm:$0xff] %vm441_vm2, %v560_v25 }
 0x262   : > { %v530_v26 = vpop.trf.xlu2 }
 0x263   : > { %578 = vst.msk [vmem:[%s876_s19 + $0x68] sm:$0xff] %vm441_vm2, %v530_v26 }
 0x266   : > { %v561_v27 = vpop.trf.xlu0 }
 0x267   : > { %593 = vst.msk [vmem:[%s876_s19 + $0xe0] sm:$0xff] %vm441_vm2, %v561_v27 }
 0x26a   : > { %v531_v28 = vpop.trf.xlu2 }
 0x26b   : > { %579 = vst.msk [vmem:[%s876_s19 + $0x70] sm:$0xff] %vm441_vm2, %v531_v28 }
 0x26e   : > { %v562_v29 = vpop.trf.xlu0 }
 0x26f   : > { %594 = vst.msk [vmem:[%s876_s19 + $0xe8] sm:$0xff] %vm441_vm2, %v562_v29 }
 0x272   : > { %v532_v30 = vpop.trf.xlu2 }
 0x273   : > { %580 = vst.msk [vmem:[%s876_s19 + $0x78] sm:$0xff] %vm441_vm2, %v532_v30 }
 0x276   : > { %v563_v31 = vpop.trf.xlu0 }
 0x277   : > { %595 = vst.msk [vmem:[%s876_s19 + $0xf0] sm:$0xff] %vm441_vm2, %v563_v31 }
 0x27e   : > { %v564_v32 = vpop.trf.xlu0 }
 0x27f   : > { %596 = vst.msk [vmem:[%s876_s19 + $0xf8] sm:$0xff] %vm441_vm2, %v564_v32 }
 0x280 PF: > { %s15_s18 = sadd.s32 1, %s724_s18  }
 0x281   : > { %p12_p4 = scmp.ge.s32.totalorder %s15_s18, 4  }
 0x283   :  { %14 = sbr.rel (!%p12_p4) target bundleno = 1 (0x1), region = 70 }

</bundles_post_ra>
